<compile_context>
chip_gen: v6e
topology: v6e:2x2x1
jax: 0.10.0
libtpu: 0.0.40
codegen_flags: <defaults>
</compile_context>

<pallas_src>
import functools

import jax
import jax.numpy as jnp
from jax import lax
from jax.experimental import pallas as pl
from jax.experimental.pallas import tpu as pltpu


_VMEM_BLOCK_BUDGET = 24 * 2**20   # target working set for pipelined blocks
_VMEM_LIMIT_CAP = 48 * 2**20      # <= ~75% of v7x's 64 MiB physical VMEM


def _largest_divisor_le(n, cap):
    cap = max(1, min(n, cap))
    for d in range(cap, 0, -1):
        if n % d == 0:
            return d
    return 1


def _vmem_limit(need_bytes):
    return int(min(_VMEM_LIMIT_CAP, max(16 * 2**20, int(1.5 * need_bytes))))


# ----------------------------------------------------------------------------
# Kernels
# ----------------------------------------------------------------------------

def _mix_kernel_mxu(xr_ref, xi_ref, w_ref, or_ref, oi_ref):
    """Per-mode channel mixing on the MXU (mode-major layout).

    xr_ref/xi_ref : (TS, B, Cin)    real / imag spectra
    w_ref         : (TS, Cin, Cout) real weight, tiled along the mode grid
    or_ref/oi_ref : (TS, B, Cout)
    """
    w = w_ref[...]
    or_ref[...] = jnp.einsum(
        "sbi,sio->sbo", xr_ref[...], w,
        preferred_element_type=jnp.float32).astype(or_ref.dtype)
    oi_ref[...] = jnp.einsum(
        "sbi,sio->sbo", xi_ref[...], w,
        preferred_element_type=jnp.float32).astype(oi_ref.dtype)


def _mix_kernel_vpu(xr_ref, xi_ref, w_ref, or_ref, oi_ref, *, cin):
    """VPU fallback for tiny input-channel counts (cin < 16).

    xr_ref/xi_ref : (TB, Cin, S)
    w_ref         : (Cin, Cout, S)  grid-invariant (tiny on this path)
    or_ref/oi_ref : (TB, Cout, S)
    """
    accr = jnp.zeros(or_ref.shape, jnp.float32)
    acci = jnp.zeros(oi_ref.shape, jnp.float32)
    # cin is small (< 16) on this path by construction, so a short static
    # unroll is fine; each weight slice is loaded once and reused for the
    # real and imag halves.  Large-cin cases take the MXU path instead.
    for i in range(cin):
        wi = w_ref[i:i + 1, :, :]                     # (1, Cout, S)
        accr = accr + xr_ref[:, i:i + 1, :] * wi      # (TB, Cout, S)
        acci = acci + xi_ref[:, i:i + 1, :] * wi
    or_ref[...] = accr
    oi_ref[...] = acci


# ----------------------------------------------------------------------------
# pallas_call wrappers
# ----------------------------------------------------------------------------

def _spectral_mix_mxu(xr, xi, w, *, interpret=False):
    """xr, xi: [S, B, Cin] f32; w: [S, Cin, Cout] f32 -> two [S, B, Cout] f32."""
    S, B, Cin = xr.shape
    _, _, Cout = w.shape

    # Per-mode footprint (f32 bytes): r+i inputs, weight slice, r+i outputs.
    per_mode = (2 * B * Cin + Cin * Cout + 2 * B * Cout) * 4
    cap = max(1, _VMEM_BLOCK_BUDGET // (2 * per_mode))      # double-buffered
    if S >= 2:
        cap = min(cap, max(1, S // 2))   # >= 2 grid steps: megacore + pipelining
    ts = _largest_divisor_le(S, cap)
    grid = (S // ts,)
    need = 2 * ts * per_mode

    grid_spec = pltpu.PrefetchScalarGridSpec(
        num_scalar_prefetch=0,
        grid=grid,
        in_specs=[
            pl.BlockSpec((ts, B, Cin), lambda m: (m, 0, 0)),
            pl.BlockSpec((ts, B, Cin), lambda m: (m, 0, 0)),
            # Weight is tiled along the mode grid -> bounded VMEM footprint.
            pl.BlockSpec((ts, Cin, Cout), lambda m: (m, 0, 0)),
        ],
        out_specs=[
            pl.BlockSpec((ts, B, Cout), lambda m: (m, 0, 0)),
            pl.BlockSpec((ts, B, Cout), lambda m: (m, 0, 0)),
        ],
    )
    return pl.pallas_call(
        _mix_kernel_mxu,
        out_shape=(jax.ShapeDtypeStruct((S, B, Cout), jnp.float32),
                   jax.ShapeDtypeStruct((S, B, Cout), jnp.float32)),
        grid_spec=grid_spec,
        compiler_params=pltpu.CompilerParams(
            dimension_semantics=("parallel",),
            vmem_limit_bytes=_vmem_limit(need)),
        interpret=interpret,
    )(xr, xi, w)


def _spectral_mix_vpu(xr, xi, w, *, interpret=False):
    """xr, xi: [B, Cin, S] f32; w: [Cin, Cout, S] f32 -> two [B, Cout, S] f32."""
    B, Cin, S = xr.shape
    _, Cout, _ = w.shape

    w_bytes = Cin * Cout * S * 4
    per_b = 2 * (2 * Cin * S + 2 * Cout * S) * 4   # double-buffered x/out rows
    # Keep the two f32 accumulators roughly vreg-resident (<= ~96 KiB total).
    acc_cap = max(1, (96 * 1024) // max(1, 2 * Cout * S * 4))
    dma_cap = max(1, (_VMEM_BLOCK_BUDGET - 2 * w_bytes) // per_b)
    tb = _largest_divisor_le(B, min(acc_cap, dma_cap))
    grid = (B // tb,)
    need = tb * per_b + 2 * w_bytes

    kernel = functools.partial(_mix_kernel_vpu, cin=Cin)
    grid_spec = pltpu.PrefetchScalarGridSpec(
        num_scalar_prefetch=0,
        grid=grid,
        in_specs=[
            pl.BlockSpec((tb, Cin, S), lambda b: (b, 0, 0)),
            pl.BlockSpec((tb, Cin, S), lambda b: (b, 0, 0)),
            # Grid-invariant weight block (fetched once; tiny on this path).
            pl.BlockSpec((Cin, Cout, S), lambda b: (0, 0, 0)),
        ],
        out_specs=[
            pl.BlockSpec((tb, Cout, S), lambda b: (b, 0, 0)),
            pl.BlockSpec((tb, Cout, S), lambda b: (b, 0, 0)),
        ],
    )
    return pl.pallas_call(
        kernel,
        out_shape=(jax.ShapeDtypeStruct((B, Cout, S), jnp.float32),
                   jax.ShapeDtypeStruct((B, Cout, S), jnp.float32)),
        grid_spec=grid_spec,
        compiler_params=pltpu.CompilerParams(
            dimension_semantics=("parallel",),
            vmem_limit_bytes=_vmem_limit(need)),
        interpret=interpret,
    )(xr, xi, w)


# ----------------------------------------------------------------------------
# Forward pass
# ----------------------------------------------------------------------------

def spectral_conv1d(x, weight, *, use_mxu=None, interpret=False):
    """Forward pass of SpectralConv1d.

    x      : [B, Cin, W] float32
    weight : [Cin, Cout, S] float32, S <= W//2 + 1
    returns: [B, Cout, 2*(W//2)] float32 — matches torch.fft.irfft's default
             output length (== W for even W, W-1 for odd W, same as PyTorch).
    """
    B, Cin, W = x.shape
    _, Cout, S = weight.shape
    n_freq = W // 2 + 1
    assert S <= n_freq

    # TODO(synk): rfft/irfft have no Pallas TPU primitive; they stay in XLA.
    spectral = jnp.fft.rfft(x.astype(jnp.float32), axis=-1)[:, :, :S]   # [B,Cin,S] c64
    xr = jnp.real(spectral)
    xi = jnp.imag(spectral)
    w = weight.astype(jnp.float32)

    if use_mxu is None:
        # The VPU broadcast-MAC becomes VALU-bound around Cin ~ 16; above that
        # the MXU (mode-major) contraction wins.
        use_mxu = Cin >= 16

    if use_mxu:
        # Mode-major layout: per-mode (B x Cin) @ (Cin x Cout) on the MXU.
        outr, outi = _spectral_mix_mxu(
            jnp.transpose(xr, (2, 0, 1)),            # [S, B, Cin]
            jnp.transpose(xi, (2, 0, 1)),
            jnp.transpose(w, (2, 0, 1)),             # [S, Cin, Cout]
            interpret=interpret)
        mixed = lax.complex(jnp.transpose(outr, (1, 2, 0)),
                            jnp.transpose(outi, (1, 2, 0)))              # [B,Cout,S]
    else:
        outr, outi = _spectral_mix_vpu(xr, xi, w, interpret=interpret)   # [B,Cout,S]
        mixed = lax.complex(outr, outi)

    # Zero-fill the unused high modes and invert (same output length as torch).
    buf = jnp.pad(mixed, ((0, 0), (0, 0), (0, n_freq - S)))
    return jnp.fft.irfft(buf, n=2 * (n_freq - 1), axis=-1).astype(jnp.float32)


def spectral_conv1d_ref(x, weight):
    """Pure-JAX reference mirroring the PyTorch forward exactly."""
    B, Cin, W = x.shape
    _, Cout, S = weight.shape
    n_freq = W // 2 + 1
    spectral = jnp.fft.rfft(x, axis=-1)
    mixed = jnp.sum(spectral[:, :, None, :S] * weight[None, :, :, :], axis=1)
    buf = jnp.zeros((B, Cout, n_freq), dtype=spectral.dtype)
    buf = buf.at[:, :, :S].set(mixed)
    return jnp.fft.irfft(buf, n=2 * (n_freq - 1), axis=-1)


def _make_inputs(key, B, Cin, Cout, W, S):
    kx, kw = jax.random.split(key)
    x = jax.random.uniform(kx, (B, Cin, W), dtype=jnp.float32)
    # nn.init.uniform_(weight, a=0.0, b=1/(Cin*Cout)), deterministic here.
    weight = jax.random.uniform(kw, (Cin, Cout, S), dtype=jnp.float32,
                                minval=0.0, maxval=1.0 / (Cin * Cout))
    return x, weight


if __name__ == "__main__":
    fwd = jax.jit(spectral_conv1d)
    key = jax.random.PRNGKey(0)
    k1, k2 = jax.random.split(key)

    # 1) Toy shape from the module docstring (tiny channels -> VPU fallback).
    B, Cin, Cout, W, S = 2, 4, 3, 16, 8          # S <= W//2 + 1 = 9
    x, weight = _make_inputs(k1, B, Cin, Cout, W, S)
    out = jax.block_until_ready(fwd(x, weight))
    ref = spectral_conv1d_ref(x, weight)
    assert out.shape == (B, Cout, W), out.shape
    assert jnp.allclose(out, ref, atol=1e-5, rtol=1e-5), "VPU path mismatch"

    # 2) Channel count large enough to take the MXU (mode-major) path.
    B2, Cin2, Cout2, W2, S2 = 8, 32, 32, 64, 16
    x2, w2 = _make_inputs(k2, B2, Cin2, Cout2, W2, S2)
    out2 = jax.block_until_ready(fwd(x2, w2))
    ref2 = spectral_conv1d_ref(x2, w2)
    assert out2.shape == (B2, Cout2, W2), out2.shape
    assert jnp.allclose(out2, ref2, atol=1e-3, rtol=1e-3), "MXU path mismatch"

    print("KERNEL_OK")
</pallas_src>

<mosaic_0001>
module attributes {stable_mosaic.version = 11 : i64} {
  func.func @_mix_kernel_vpu(%arg0: i32, %arg1: memref<2x4x8xf32, #tpu.memory_space<vmem>>, %arg2: memref<2x4x8xf32, #tpu.memory_space<vmem>>, %arg3: memref<4x3x8xf32, #tpu.memory_space<vmem>>, %arg4: memref<2x3x8xf32, #tpu.memory_space<vmem>>, %arg5: memref<2x3x8xf32, #tpu.memory_space<vmem>>) attributes {dimension_semantics = [#tpu.dimension_semantics<parallel>], iteration_bounds = array<i64: 1>, scalar_prefetch = 0 : i64, scratch_operands = 0 : i64, tpu.core_type = #tpu.core_type<tc>, window_params = [{transform_indices = @transform_0, window_bounds = array<i64: 2, 4, 8>}, {transform_indices = @transform_1, window_bounds = array<i64: 2, 4, 8>}, {pipeline_mode = #tpu.pipeline_mode<synchronous>, transform_indices = @transform_2, window_bounds = array<i64: 4, 3, 8>}, {transform_indices = @transform_3, window_bounds = array<i64: 2, 3, 8>}, {transform_indices = @transform_4, window_bounds = array<i64: 2, 3, 8>}]} {
    %cst = arith.constant 0.000000e+00 : f32
    %0 = vector.broadcast %cst : f32 to vector<2x3x8xf32>
    %cst_0 = arith.constant 0.000000e+00 : f32
    %1 = vector.broadcast %cst_0 : f32 to vector<2x3x8xf32>
    %c0 = arith.constant 0 : index
    %c0_1 = arith.constant 0 : index
    %c0_2 = arith.constant 0 : index
    %2 = vector.load %arg3[%c0, %c0_1, %c0_2] : memref<4x3x8xf32, #tpu.memory_space<vmem>>, vector<1x3x8xf32>
    %c0_3 = arith.constant 0 : index
    %c0_4 = arith.constant 0 : index
    %c0_5 = arith.constant 0 : index
    %3 = vector.load %arg1[%c0_3, %c0_4, %c0_5] : memref<2x4x8xf32, #tpu.memory_space<vmem>>, vector<2x1x8xf32>
    %4 = vector.broadcast %3 : vector<2x1x8xf32> to vector<2x3x8xf32>
    %5 = vector.broadcast %2 : vector<1x3x8xf32> to vector<2x3x8xf32>
    %6 = arith.mulf %4, %5 : vector<2x3x8xf32>
    %7 = arith.addf %0, %6 : vector<2x3x8xf32>
    %c0_6 = arith.constant 0 : index
    %c0_7 = arith.constant 0 : index
    %c0_8 = arith.constant 0 : index
    %8 = vector.load %arg2[%c0_6, %c0_7, %c0_8] : memref<2x4x8xf32, #tpu.memory_space<vmem>>, vector<2x1x8xf32>
    %9 = vector.broadcast %8 : vector<2x1x8xf32> to vector<2x3x8xf32>
    %10 = vector.broadcast %2 : vector<1x3x8xf32> to vector<2x3x8xf32>
    %11 = arith.mulf %9, %10 : vector<2x3x8xf32>
    %12 = arith.addf %1, %11 : vector<2x3x8xf32>
    %c1 = arith.constant 1 : index
    %c0_9 = arith.constant 0 : index
    %c0_10 = arith.constant 0 : index
    %13 = vector.load %arg3[%c1, %c0_9, %c0_10] : memref<4x3x8xf32, #tpu.memory_space<vmem>>, vector<1x3x8xf32>
    %c0_11 = arith.constant 0 : index
    %c1_12 = arith.constant 1 : index
    %c0_13 = arith.constant 0 : index
    %14 = vector.load %arg1[%c0_11, %c1_12, %c0_13] : memref<2x4x8xf32, #tpu.memory_space<vmem>>, vector<2x1x8xf32>
    %15 = vector.broadcast %14 : vector<2x1x8xf32> to vector<2x3x8xf32>
    %16 = vector.broadcast %13 : vector<1x3x8xf32> to vector<2x3x8xf32>
    %17 = arith.mulf %15, %16 : vector<2x3x8xf32>
    %18 = arith.addf %7, %17 : vector<2x3x8xf32>
    %c0_14 = arith.constant 0 : index
    %c1_15 = arith.constant 1 : index
    %c0_16 = arith.constant 0 : index
    %19 = vector.load %arg2[%c0_14, %c1_15, %c0_16] : memref<2x4x8xf32, #tpu.memory_space<vmem>>, vector<2x1x8xf32>
    %20 = vector.broadcast %19 : vector<2x1x8xf32> to vector<2x3x8xf32>
    %21 = vector.broadcast %13 : vector<1x3x8xf32> to vector<2x3x8xf32>
    %22 = arith.mulf %20, %21 : vector<2x3x8xf32>
    %23 = arith.addf %12, %22 : vector<2x3x8xf32>
    %c2 = arith.constant 2 : index
    %c0_17 = arith.constant 0 : index
    %c0_18 = arith.constant 0 : index
    %24 = vector.load %arg3[%c2, %c0_17, %c0_18] : memref<4x3x8xf32, #tpu.memory_space<vmem>>, vector<1x3x8xf32>
    %c0_19 = arith.constant 0 : index
    %c2_20 = arith.constant 2 : index
    %c0_21 = arith.constant 0 : index
    %25 = vector.load %arg1[%c0_19, %c2_20, %c0_21] : memref<2x4x8xf32, #tpu.memory_space<vmem>>, vector<2x1x8xf32>
    %26 = vector.broadcast %25 : vector<2x1x8xf32> to vector<2x3x8xf32>
    %27 = vector.broadcast %24 : vector<1x3x8xf32> to vector<2x3x8xf32>
    %28 = arith.mulf %26, %27 : vector<2x3x8xf32>
    %29 = arith.addf %18, %28 : vector<2x3x8xf32>
    %c0_22 = arith.constant 0 : index
    %c2_23 = arith.constant 2 : index
    %c0_24 = arith.constant 0 : index
    %30 = vector.load %arg2[%c0_22, %c2_23, %c0_24] : memref<2x4x8xf32, #tpu.memory_space<vmem>>, vector<2x1x8xf32>
    %31 = vector.broadcast %30 : vector<2x1x8xf32> to vector<2x3x8xf32>
    %32 = vector.broadcast %24 : vector<1x3x8xf32> to vector<2x3x8xf32>
    %33 = arith.mulf %31, %32 : vector<2x3x8xf32>
    %34 = arith.addf %23, %33 : vector<2x3x8xf32>
    %c3 = arith.constant 3 : index
    %c0_25 = arith.constant 0 : index
    %c0_26 = arith.constant 0 : index
    %35 = vector.load %arg3[%c3, %c0_25, %c0_26] : memref<4x3x8xf32, #tpu.memory_space<vmem>>, vector<1x3x8xf32>
    %c0_27 = arith.constant 0 : index
    %c3_28 = arith.constant 3 : index
    %c0_29 = arith.constant 0 : index
    %36 = vector.load %arg1[%c0_27, %c3_28, %c0_29] : memref<2x4x8xf32, #tpu.memory_space<vmem>>, vector<2x1x8xf32>
    %37 = vector.broadcast %36 : vector<2x1x8xf32> to vector<2x3x8xf32>
    %38 = vector.broadcast %35 : vector<1x3x8xf32> to vector<2x3x8xf32>
    %39 = arith.mulf %37, %38 : vector<2x3x8xf32>
    %40 = arith.addf %29, %39 : vector<2x3x8xf32>
    %c0_30 = arith.constant 0 : index
    %c3_31 = arith.constant 3 : index
    %c0_32 = arith.constant 0 : index
    %41 = vector.load %arg2[%c0_30, %c3_31, %c0_32] : memref<2x4x8xf32, #tpu.memory_space<vmem>>, vector<2x1x8xf32>
    %42 = vector.broadcast %41 : vector<2x1x8xf32> to vector<2x3x8xf32>
    %43 = vector.broadcast %35 : vector<1x3x8xf32> to vector<2x3x8xf32>
    %44 = arith.mulf %42, %43 : vector<2x3x8xf32>
    %45 = arith.addf %34, %44 : vector<2x3x8xf32>
    %c0_33 = arith.constant 0 : index
    %c0_34 = arith.constant 0 : index
    %c0_35 = arith.constant 0 : index
    %46 = vector.load %arg4[%c0_33, %c0_34, %c0_35] : memref<2x3x8xf32, #tpu.memory_space<vmem>>, vector<2x3x8xf32>
    tpu.vector_store %arg4[%c0_33, %c0_34, %c0_35], %40 {strides = array<i32>} : memref<2x3x8xf32, #tpu.memory_space<vmem>>, vector<2x3x8xf32>,
    %c0_36 = arith.constant 0 : index
    %c0_37 = arith.constant 0 : index
    %c0_38 = arith.constant 0 : index
    %47 = vector.load %arg5[%c0_36, %c0_37, %c0_38] : memref<2x3x8xf32, #tpu.memory_space<vmem>>, vector<2x3x8xf32>
    tpu.vector_store %arg5[%c0_36, %c0_37, %c0_38], %45 {strides = array<i32>} : memref<2x3x8xf32, #tpu.memory_space<vmem>>, vector<2x3x8xf32>,
    return
  }
  func.func @transform_0(%arg0: i32) -> (i32, i32, i32) {
    %c0_i32 = arith.constant 0 : i32
    %c0_i32_0 = arith.constant 0 : i32
    %c0_i32_1 = arith.constant 0 : i32
    return %arg0, %c0_i32, %c0_i32_0 : i32, i32, i32
  }
  func.func @transform_1(%arg0: i32) -> (i32, i32, i32) {
    %c0_i32 = arith.constant 0 : i32
    %c0_i32_0 = arith.constant 0 : i32
    %c0_i32_1 = arith.constant 0 : i32
    return %arg0, %c0_i32, %c0_i32_0 : i32, i32, i32
  }
  func.func @transform_2(%arg0: i32) -> (i32, i32, i32) {
    %c0_i32 = arith.constant 0 : i32
    %c0_i32_0 = arith.constant 0 : i32
    %c0_i32_1 = arith.constant 0 : i32
    %c0_i32_2 = arith.constant 0 : i32
    return %c0_i32, %c0_i32_0, %c0_i32_1 : i32, i32, i32
  }
  func.func @transform_3(%arg0: i32) -> (i32, i32, i32) {
    %c0_i32 = arith.constant 0 : i32
    %c0_i32_0 = arith.constant 0 : i32
    %c0_i32_1 = arith.constant 0 : i32
    return %arg0, %c0_i32, %c0_i32_0 : i32, i32, i32
  }
  func.func @transform_4(%arg0: i32) -> (i32, i32, i32) {
    %c0_i32 = arith.constant 0 : i32
    %c0_i32_0 = arith.constant 0 : i32
    %c0_i32_1 = arith.constant 0 : i32
    return %arg0, %c0_i32, %c0_i32_0 : i32, i32, i32
  }
}

</mosaic_0001>

<bundles_post_ra>
// kernel: reverse.1
= control target key start
LH: loop header
LB: loop body
LE: loop exit
PB: predicated region body
PF: predicated region fallthrough
CT: control target
= control target key end

     0   :  { %v2_v0 = vlaneseq  ;;  %s155_s0 = inlined_call_operand.vmem [shape: f32[2,3,7], index: 0, kind: input, shape index: {}]   ;;  %s156_s1 = inlined_call_operand.vmem [shape: f32[2,3,7], index: 1, kind: output, shape index: {}]  }
   0x2   :  { %v3_v1 = vsub.s32 6, %v2_v0 }
   0x4   :  { %4 = vset.pattern.permute.xlu0 %v3_v1 }
   0x5   :  { %v21_v2 = vld [vmem:[%s155_s0] sm:$0xff]  }
   0x6   :  { %22 = vst [vmem:[#allocation1] sm:$0xff] %v21_v2  }
   0xd   :  { %v57_v3 = vld [vmem:[#allocation1] sm:$0xf]  ;;  %v54_v4 = vld [vmem:[#allocation1 + $0x4] sm:$0xf] }
   0xe   :  { %58 = vst [vmem:[#allocation0] sm:$0xf] %v57_v3  ;;  %56 = vst [vmem:[#allocation0 + $0x8] sm:$0xf] %v54_v4 }
  0x15   :  { %v59_v5 = vld [vmem:[#allocation0] sm:$0xff]  ;;  %v65_v6 = vld [vmem:[#allocation0 + $0x8] sm:$0xff] }
  0x16   :  { %60 = vperm.xlu0 %4, %v59_v5  }
  0x1a   :  { %66 = vperm.xlu0 %4, %v65_v6  }
  0x91   :  { %v61_v7 = vpop.permute.xlu0 %60 }
  0x92   :  { %62 = vst [vmem:[#allocation2 + $0x8] sm:$0xff] %v61_v7 }
  0x95   :  { %v67_v8 = vpop.permute.xlu0 %66 }
  0x96   :  { %68 = vst [vmem:[#allocation2] sm:$0xff] %v67_v8 }
  0x99   :  { %v73_v9 = vld [vmem:[#allocation2 + $0x8] sm:$0xf] }
  0x9a   :  { %76 = vst [vmem:[#allocation3] sm:$0xf] %v73_v9 }
  0x9d   :  { %v78_v10 = vld [vmem:[#allocation2] sm:$0xf] }
  0x9e   :  { %82 = vst [vmem:[#allocation3 + $0x4] sm:$0xf] %v78_v10 }
  0xa1   :  { %v99_v11 = vld [vmem:[#allocation3] sm:$0xf] }
  0xa2   :  { %100 = vst [vmem:[%s156_s1] sm:$0xf] %v99_v11 }
  0xa5   :  { %v101_v12 = vld [vmem:[#allocation3 + $0x4] sm:$0xf] }
  0xa6   :  { %102 = vst [vmem:[%s156_s1 + $0x4] sm:$0xf] %v101_v12 }

// kernel: spectral_conv1d.1
= control target key start
LH: loop header
LB: loop body
LE: loop exit
PB: predicated region body
PF: predicated region fallthrough
CT: control target
= control target key end

     0   :  { %vm135_vm0 = vcmask 59392   ;;  %s268_s0 = inlined_call_operand.vmem [shape: f32[2,4,8], index: 0, kind: input, shape index: {}]   ;;  %s269_s2 = inlined_call_operand.vmem [shape: f32[4,3,8], index: 2, kind: input, shape index: {}]   ;;  %s270_s1 = inlined_call_operand.vmem [shape: f32[2,4,8], index: 1, kind: input, shape index: {}]   ;;  %s271_s3 = inlined_call_operand.vmem [shape: f32[2,3,8], index: 3, kind: output, shape index: {0}]   ;;  %s272_s4 = inlined_call_operand.vmem [shape: f32[2,3,8], index: 4, kind: output, shape index: {1}]  }
   0x1   :  { %v16_v0 = vld [vmem:[%s269_s2] sm:$0x7]  ;;  %v152_v2 = vld [vmem:[%s269_s2 + $0x4] sm:$0x7]  ;;  %v157_v5 = vld [vmem:[%s269_s2 + $0x8] sm:$0x7] }
   0x2   :  { %v148_v1 = vld [vmem:[%s268_s0] ss:$0 sm:$0xff]  ;;  %v153_v4 = vld [vmem:[%s268_s0 + $0x1] ss:$0 sm:$0xff]  ;;  %v158_v6 = vld [vmem:[%s268_s0 + $0x2] ss:$0 sm:$0xff] }
   0x3   :  { %v27_v3 = vmul.f32 %v148_v1, %v16_v0  ;;  %v57_v7 = vmul.f32 %v153_v4, %v152_v2  ;;  %v87_v8 = vmul.f32 %v158_v6, %v157_v5  ;;  %v162_v9 = vld [vmem:[%s269_s2 + $0xc] sm:$0x7]  ;;  %v163_v10 = vld [vmem:[%s268_s0 + $0x3] ss:$0 sm:$0xff]  ;;  %v149_v11 = vld [vmem:[%s268_s0 + $0x4] ss:$0 sm:$0xff] }
   0x4   :  { %v28_v12 = vmul.f32 %v149_v11, %v16_v0  ;;  %v154_v13 = vld [vmem:[%s268_s0 + $0x5] ss:$0 sm:$0xff]  ;;  %v159_v14 = vld [vmem:[%s268_s0 + $0x6] ss:$0 sm:$0xff]  ;;  %v164_v15 = vld [vmem:[%s268_s0 + $0x7] ss:$0 sm:$0xff]  ;;  %v117_v17 = vmul.f32 %v163_v10, %v162_v9 }
   0x5   :  { %v59_v16 = vadd.f32 %v57_v7, %v27_v3  ;;  %v58_v18 = vmul.f32 %v154_v13, %v152_v2  ;;  %v88_v19 = vmul.f32 %v159_v14, %v157_v5  ;;  %v150_v20 = vld [vmem:[%s270_s1] ss:$0 sm:$0xff]  ;;  %v155_v21 = vld [vmem:[%s270_s1 + $0x1] ss:$0 sm:$0xff]  ;;  %v160_v22 = vld [vmem:[%s270_s1 + $0x2] ss:$0 sm:$0xff]  ;;  %v118_v31 = vmul.f32 %v164_v15, %v162_v9 }
   0x6   :  { %v41_v23 = vmul.f32 %v150_v20, %v16_v0  ;;  %v71_v24 = vmul.f32 %v155_v21, %v152_v2  ;;  %v101_v25 = vmul.f32 %v160_v22, %v157_v5  ;;  %v165_v26 = vld [vmem:[%s270_s1 + $0x3] ss:$0 sm:$0xff]  ;;  %v151_v27 = vld [vmem:[%s270_s1 + $0x4] ss:$0 sm:$0xff]  ;;  %v156_v28 = vld [vmem:[%s270_s1 + $0x5] ss:$0 sm:$0xff] }
   0x7   :  { %v89_v29 = vadd.f32 %v87_v8, %v59_v16  ;;  %v60_v30 = vadd.f32 %v58_v18, %v28_v12  ;;  %v42_v32 = vmul.f32 %v151_v27, %v16_v0  ;;  %v161_v33 = vld [vmem:[%s270_s1 + $0x6] ss:$0 sm:$0xff]  ;;  %v166_v34 = vld [vmem:[%s270_s1 + $0x7] ss:$0 sm:$0xff]  ;;  %v131_v36 = vmul.f32 %v165_v26, %v162_v9 }
   0x8   :  { %v73_v35 = vadd.f32 %v71_v24, %v41_v23  ;;  %v72_v37 = vmul.f32 %v156_v28, %v152_v2  ;;  %v102_v38 = vmul.f32 %v161_v33, %v157_v5  ;;  %v132_v43 = vmul.f32 %v166_v34, %v162_v9 }
   0x9   :  { %v119_v39 = vadd.f32 %v117_v17, %v89_v29  ;;  %v90_v40 = vadd.f32 %v88_v19, %v60_v30 }
   0xa   :  { %v103_v41 = vadd.f32 %v101_v25, %v73_v35  ;;  %v74_v42 = vadd.f32 %v72_v37, %v42_v32 }
   0xb   :  { %136 = vst.msk [vmem:[%s271_s3] sm:$0x7] %vm135_vm0, %v119_v39  ;;  %v120_v44 = vadd.f32 %v118_v31, %v90_v40 }
   0xc   :  { %v133_v45 = vadd.f32 %v131_v36, %v103_v41  ;;  %v104_v46 = vadd.f32 %v102_v38, %v74_v42 }
   0xd   :  { %137 = vst.msk [vmem:[%s271_s3 + $0x4] sm:$0x7] %vm135_vm0, %v120_v44 }
   0xe   :  { %138 = vst.msk [vmem:[%s272_s4] sm:$0x7] %vm135_vm0, %v133_v45  ;;  %v134_v47 = vadd.f32 %v132_v43, %v104_v46 }
  0x10   :  { %139 = vst.msk [vmem:[%s272_s4 + $0x4] sm:$0x7] %vm135_vm0, %v134_v47 }

</bundles_post_ra>
